<compile_context>
chip_gen: v7x
topology: tpu7x:2x2x1
jax: 0.10.0
libtpu: 0.0.40
codegen_flags: <defaults>
</compile_context>

<pallas_src>
import functools

import jax
import jax.numpy as jnp
from jax import lax
from jax.experimental import pallas as pl
from jax.experimental.pallas import tpu as pltpu

_LANES = 128
_SUBLANES = 8
_CHUNK_ROWS = 1024              # in-kernel compute chunk (bounds VMEM temporaries)
_DEFAULT_ROW_BLOCK = 8192       # per-grid-step DMA block (4 MiB f32 / input / buffer)
_VMEM_LIMIT_BYTES = 40 * 1024 * 1024  # > v5e's 16 MiB scoped default, < v7x's 64 MiB physical


def _round_up(x, m):
    return -(-x // m) * m


def _round_down(x, m):
    return (x // m) * m


def _detect_num_tensorcores():
    """Best-effort TensorCore count per chip: 2 on v7x, else 1 (v5e/v6e).

    Defensive: on any failure fall back to 1 (always correct, just forgoes
    megacore sharding of the leading grid axis)."""
    try:
        kind = (jax.devices()[0].device_kind or "").lower()
    except Exception:
        return 1
    return 2 if ("v7" in kind or "tpu7" in kind) else 1


def _focal_elementwise(x, t, alpha, gamma):
    """Pure-jnp per-element focal loss (reference, tiny-input and tail paths)."""
    x = x.astype(jnp.float32)
    t = t.astype(jnp.float32)
    bce = jnp.maximum(x, 0.0) - x * t + jnp.log1p(jnp.exp(-jnp.abs(x)))
    pt = jnp.exp(-bce)
    return alpha * (1.0 - pt) ** gamma * bce


def focal_loss_ref(inputs, targets, alpha=1.0, gamma=2.0):
    return jnp.mean(_focal_elementwise(inputs, targets, float(alpha), float(gamma)))


def _focal_loss_kernel(x_ref, t_ref, out_ref, *, alpha, gamma, valid_rows,
                       block_rows, chunk_rows, steps_per_core, binary_targets):
    core = pl.program_id(0)
    step = pl.program_id(1)

    # Output block (8,128) is revisited along the reduction ("arbitrary") axis
    # -> stays resident in VMEM and acts as the per-core accumulator.
    @pl.when(step == 0)
    def _():
        out_ref[...] = jnp.zeros_like(out_ref)

    gblock = core * steps_per_core + step
    block_row0 = gblock * block_rows   # int32 row index: safe for < 2**31 rows

    def process_chunk(r0):
        x = x_ref[pl.ds(r0, chunk_rows), :].astype(jnp.float32)
        t = t_ref[pl.ds(r0, chunk_rows), :].astype(jnp.float32)

        e = jnp.exp(-jnp.abs(x))                              # EUP
        bce = jnp.maximum(x, 0.0) - x * t + jnp.log1p(e)      # EUP (log1p)
        if binary_targets:
            # pt = exp(-bce) = exp(x*t - max(x,0)) / (1 + e); for hard {0,1}
            # targets the numerator is a pure select, so the second exp becomes
            # a cheap approximate vrcp (frees EUP slots on v7x).
            num = jnp.where(t > 0.5,
                            jnp.where(x < 0.0, e, 1.0),
                            jnp.where(x > 0.0, e, 1.0))
            pt = num * pl.reciprocal(1.0 + e, approx=True)
        else:
            pt = jnp.exp(-bce)                                # EUP
        d = jnp.maximum(1.0 - pt, 0.0)  # guard pt>1 rounding -> NaN in pow
        if float(gamma) == 2.0:
            mod = d * d                 # explicit square: no float-exponent pow
        elif float(gamma) == 1.0:
            mod = d
        else:
            mod = d ** gamma
        fl = mod * bce
        if float(alpha) != 1.0:
            fl = alpha * fl

        chunk_row0 = block_row0 + r0

        def accumulate(v):
            # Per-lane / per-sublane partial sums only (VPU adds); the single
            # expensive cross-lane reduce is deferred to the wrapper epilogue.
            out_ref[...] += v.reshape(chunk_rows // _SUBLANES, _SUBLANES,
                                      _LANES).sum(axis=0)

        @pl.when(chunk_row0 + chunk_rows <= valid_rows)
        def _():
            accumulate(fl)              # fast path: full blocks pay no mask work

        @pl.when(chunk_row0 + chunk_rows > valid_rows)
        def _():
            # Chunk touches (or lies past) the array edge: edge blocks contain
            # garbage rows there -> zero them.  Row-level compare (no 32-bit
            # flat-index overflow; also handles fully "phantom" blocks).
            row = lax.broadcasted_iota(jnp.int32, (chunk_rows, _LANES), 0)
            accumulate(jnp.where(row < valid_rows - chunk_row0, fl, 0.0))

    n_chunks = block_rows // chunk_rows
    if n_chunks == 1:
        process_chunk(0)
    else:
        @pl.loop(0, n_chunks)
        def _(j):
            process_chunk(pl.multiple_of(j * chunk_rows, chunk_rows))


def focal_loss(inputs, targets, alpha=1.0, gamma=2.0, *, row_block=None,
               num_cores=None, binary_targets=False):
    """Mean focal loss over logits `inputs` / targets `targets` (any shape).

    Targets may be streamed in any dtype (e.g. bf16/int8 hard labels) -- the
    kernel casts in-VMEM, so no wrapper-side cast / extra HBM pass is added.
    Set binary_targets=True only when targets are exactly {0,1}.
    """
    assert inputs.shape == targets.shape
    n_elems = inputs.size
    alpha = float(alpha)
    gamma = float(gamma)

    flat_x = inputs.reshape(-1)   # free reshape of a contiguous array
    flat_t = targets.reshape(-1)

    rows = n_elems // _LANES
    if rows < _SUBLANES:
        # < 1024 elements: not worth a kernel launch.
        return jnp.mean(_focal_elementwise(flat_x, flat_t, alpha, gamma))

    if num_cores is None:
        num_cores = _detect_num_tensorcores()
    if row_block is None:
        row_block = _DEFAULT_ROW_BLOCK
    row_block = max(_CHUNK_ROWS, _round_down(int(row_block), _CHUNK_ROWS))

    # Lane-dense bulk slab; a <128-element ragged tail is handled by XLA below.
    bulk = rows * _LANES
    tail = n_elems - bulk
    if tail:
        # TODO(synk): for very large non-128-multiple inputs this prefix slice
        # may materialize one extra copy of the bulk; 128-multiple inputs (the
        # common conv-feature-map case) take the zero-copy path.
        bulk_x, bulk_t = flat_x[:bulk], flat_t[:bulk]
    else:
        bulk_x, bulk_t = flat_x, flat_t
    x2d = bulk_x.reshape(rows, _LANES)
    t2d = bulk_t.reshape(rows, _LANES)

    # Block sizing: as large as row_block allows (amortise the ~0.35us/step
    # fixed overhead), a multiple of the in-kernel chunk, never exceeding the
    # array so BlockSpecs stay legal; always a multiple of 8 sublanes.
    per_core = -(-rows // num_cores)
    if per_core <= _CHUNK_ROWS:
        block_rows = min(_round_up(per_core, _SUBLANES),
                         _round_down(rows, _SUBLANES))
        chunk_rows = block_rows
    else:
        block_rows = min(row_block, _round_up(per_core, _CHUNK_ROWS),
                         _round_down(rows, _CHUNK_ROWS))
        chunk_rows = _CHUNK_ROWS

    total_blocks = pl.cdiv(rows, block_rows)
    steps_per_core = pl.cdiv(total_blocks, num_cores)

    kernel = functools.partial(
        _focal_loss_kernel,
        alpha=alpha, gamma=gamma, valid_rows=rows,
        block_rows=block_rows, chunk_rows=chunk_rows,
        steps_per_core=steps_per_core, binary_targets=bool(binary_targets))

    def in_map(c, i):
        # Clamp so "phantom" trailing blocks (grid rounding on the 2-core path,
        # masked to zero inside the kernel) never index past the array.
        return (jnp.minimum(c * steps_per_core + i, total_blocks - 1), 0)

    partials = pl.pallas_call(
        kernel,
        out_shape=jax.ShapeDtypeStruct((num_cores * _SUBLANES, _LANES),
                                       jnp.float32),
        grid_spec=pltpu.PrefetchScalarGridSpec(
            num_scalar_prefetch=0,
            grid=(num_cores, steps_per_core),
            in_specs=[
                pl.BlockSpec((block_rows, _LANES), in_map),
                pl.BlockSpec((block_rows, _LANES), in_map),
            ],
            out_specs=pl.BlockSpec((_SUBLANES, _LANES), lambda c, i: (c, 0)),
        ),
        compiler_params=pltpu.CompilerParams(
            dimension_semantics=("parallel", "arbitrary"),
            vmem_limit_bytes=_VMEM_LIMIT_BYTES,
        ),
    )(x2d, t2d)

    # Tiny XLA epilogue (needed anyway for the mean): single cross-lane reduce
    # of the per-core accumulators, plus the <128-element ragged tail.
    total = jnp.sum(partials)
    if tail:
        total = total + jnp.sum(
            _focal_elementwise(flat_x[bulk:], flat_t[bulk:], alpha, gamma))
    return total / jnp.float32(n_elems)


if __name__ == "__main__":
    key = jax.random.PRNGKey(0)
    kx, kt = jax.random.split(key)

    # Small NCHW shape consistent with the module's usage (logits vs binary targets).
    shape = (2, 4, 16, 16)
    inputs = jax.random.normal(kx, shape, dtype=jnp.float32)
    targets = jax.random.bernoulli(kt, 0.5, shape).astype(jnp.float32)

    loss = jax.block_until_ready(focal_loss(inputs, targets, alpha=1.0, gamma=2.0))
    ref = focal_loss_ref(inputs, targets, alpha=1.0, gamma=2.0)
    assert jnp.allclose(loss, ref, rtol=1e-5, atol=1e-6), (loss, ref)

    # Ragged shape: exercises the no-pad path (edge-block masking + XLA tail).
    shape2 = (3, 5, 7, 11)
    x2 = jax.random.normal(kx, shape2, dtype=jnp.float32)
    t2 = jax.random.bernoulli(kt, 0.5, shape2).astype(jnp.float32)
    loss2 = jax.block_until_ready(focal_loss(x2, t2))
    ref2 = focal_loss_ref(x2, t2)
    assert jnp.allclose(loss2, ref2, rtol=1e-5, atol=1e-6), (loss2, ref2)

    # Medium shape: exercises the multi-chunk inner pl.loop / multi-step grid.
    shape3 = (8, 4, 128, 128)
    x3 = jax.random.normal(kx, shape3, dtype=jnp.float32)
    t3 = jax.random.bernoulli(kt, 0.5, shape3).astype(jnp.float32)
    loss3 = jax.block_until_ready(focal_loss(x3, t3))
    ref3 = focal_loss_ref(x3, t3)
    assert jnp.allclose(loss3, ref3, rtol=5e-5, atol=1e-6), (loss3, ref3)

    # Binary-target fast path (approx reciprocal -> slightly looser tolerance).
    loss4 = jax.block_until_ready(focal_loss(inputs, targets, binary_targets=True))
    assert jnp.allclose(loss4, ref, rtol=1e-2, atol=1e-3), (loss4, ref)

    print("KERNEL_OK")
</pallas_src>

<mosaic_0001>
module attributes {stable_mosaic.version = 11 : i64} {
  func.func @_focal_loss_kernel(%arg0: i32, %arg1: i32, %arg2: memref<16x128xf32, #tpu.memory_space<vmem>>, %arg3: memref<16x128xf32, #tpu.memory_space<vmem>>, %arg4: memref<8x128xf32, #tpu.memory_space<vmem>>) attributes {dimension_semantics = [#tpu.dimension_semantics<parallel>, #tpu.dimension_semantics<arbitrary>], iteration_bounds = array<i64: 1, 1>, scalar_prefetch = 0 : i64, scratch_operands = 0 : i64, tpu.core_type = #tpu.core_type<tc>, window_params = [{transform_indices = @transform_0, window_bounds = array<i64: 16, 128>}, {transform_indices = @transform_1, window_bounds = array<i64: 16, 128>}, {transform_indices = @transform_2, window_bounds = array<i64: 8, 128>}]} {
    %c0_i32 = arith.constant 0 : i32
    %0 = arith.cmpi eq, %arg1, %c0_i32 : i32
    %1 = arith.extui %0 : i1 to i32
    %c0_i32_0 = arith.constant 0 : i32
    %2 = arith.cmpi ne, %1, %c0_i32_0 : i32
    scf.if %2 {
      %cst_15 = arith.constant 0.000000e+00 : f32
      %36 = vector.broadcast %cst_15 : f32 to vector<8x128xf32>
      %c0_16 = arith.constant 0 : index
      %c0_17 = arith.constant 0 : index
      %37 = vector.load %arg4[%c0_16, %c0_17] : memref<8x128xf32, #tpu.memory_space<vmem>>, vector<8x128xf32>
      tpu.vector_store %arg4[%c0_16, %c0_17], %36 {strides = array<i32>} : memref<8x128xf32, #tpu.memory_space<vmem>>, vector<8x128xf32>,
    } else {
    }
    %c1_i32 = arith.constant 1 : i32
    %3 = arith.muli %arg0, %c1_i32 : i32
    %4 = arith.addi %3, %arg1 : i32
    %c16_i32 = arith.constant 16 : i32
    %5 = arith.muli %4, %c16_i32 : i32
    %c0 = arith.constant 0 : index
    %c0_1 = arith.constant 0 : index
    %6 = vector.load %arg2[%c0, %c0_1] : memref<16x128xf32, #tpu.memory_space<vmem>>, vector<16x128xf32>
    %c0_2 = arith.constant 0 : index
    %c0_3 = arith.constant 0 : index
    %7 = vector.load %arg3[%c0_2, %c0_3] : memref<16x128xf32, #tpu.memory_space<vmem>>, vector<16x128xf32>
    %8 = math.absf %6 : vector<16x128xf32>
    %cst = arith.constant 0.000000e+00 : f32
    %9 = vector.broadcast %cst : f32 to vector<16x128xf32>
    %10 = arith.subf %9, %8 : vector<16x128xf32>
    %11 = math.exp %10 : vector<16x128xf32>
    %cst_4 = arith.constant 0.000000e+00 : f32
    %12 = vector.broadcast %cst_4 : f32 to vector<16x128xf32>
    %13 = arith.maximumf %6, %12 : vector<16x128xf32>
    %14 = arith.mulf %6, %7 : vector<16x128xf32>
    %15 = arith.subf %13, %14 : vector<16x128xf32>
    %16 = math.log1p %11 : vector<16x128xf32>
    %17 = arith.addf %15, %16 : vector<16x128xf32>
    %cst_5 = arith.constant 0.000000e+00 : f32
    %18 = vector.broadcast %cst_5 : f32 to vector<16x128xf32>
    %19 = arith.subf %18, %17 : vector<16x128xf32>
    %20 = math.exp %19 : vector<16x128xf32>
    %cst_6 = arith.constant 1.000000e+00 : f32
    %21 = vector.broadcast %cst_6 : f32 to vector<16x128xf32>
    %22 = arith.subf %21, %20 : vector<16x128xf32>
    %cst_7 = arith.constant 0.000000e+00 : f32
    %23 = vector.broadcast %cst_7 : f32 to vector<16x128xf32>
    %24 = arith.maximumf %22, %23 : vector<16x128xf32>
    %25 = arith.mulf %24, %24 : vector<16x128xf32>
    %26 = arith.mulf %25, %17 : vector<16x128xf32>
    %c0_i32_8 = arith.constant 0 : i32
    %27 = arith.addi %5, %c0_i32_8 : i32
    %c16_i32_9 = arith.constant 16 : i32
    %28 = arith.addi %27, %c16_i32_9 : i32
    %c16_i32_10 = arith.constant 16 : i32
    %29 = arith.cmpi sle, %28, %c16_i32_10 : i32
    %30 = arith.extui %29 : i1 to i32
    %c0_i32_11 = arith.constant 0 : i32
    %31 = arith.cmpi ne, %30, %c0_i32_11 : i32
    scf.if %31 {
      %c0_15 = arith.constant 0 : index
      %c0_16 = arith.constant 0 : index
      %36 = vector.load %arg4[%c0_15, %c0_16] : memref<8x128xf32, #tpu.memory_space<vmem>>, vector<8x128xf32>
      %37 = vector.shape_cast %26 : vector<16x128xf32> to vector<2x8x128xf32>
      %cst_17 = arith.constant dense<0.000000e+00> : vector<8x128xf32>
      %38 = vector.multi_reduction <add>, %37, %cst_17 [0] : vector<2x8x128xf32> to vector<8x128xf32>
      %39 = arith.addf %36, %38 : vector<8x128xf32>
      %c0_18 = arith.constant 0 : index
      %c0_19 = arith.constant 0 : index
      %40 = vector.load %arg4[%c0_18, %c0_19] : memref<8x128xf32, #tpu.memory_space<vmem>>, vector<8x128xf32>
      tpu.vector_store %arg4[%c0_18, %c0_19], %39 {strides = array<i32>} : memref<8x128xf32, #tpu.memory_space<vmem>>, vector<8x128xf32>,
    } else {
    }
    %c16_i32_12 = arith.constant 16 : i32
    %32 = arith.addi %27, %c16_i32_12 : i32
    %c16_i32_13 = arith.constant 16 : i32
    %33 = arith.cmpi sgt, %32, %c16_i32_13 : i32
    %34 = arith.extui %33 : i1 to i32
    %c0_i32_14 = arith.constant 0 : i32
    %35 = arith.cmpi ne, %34, %c0_i32_14 : i32
    scf.if %35 {
      %36 = tpu.iota {dimensions = array<i32: 0>} : vector<16x128xi32>
      %c16_i32_15 = arith.constant 16 : i32
      %37 = arith.subi %c16_i32_15, %27 : i32
      %38 = vector.broadcast %37 : i32 to vector<16x128xi32>
      %39 = arith.cmpi slt, %36, %38 : vector<16x128xi32>
      %cst_16 = arith.constant 0.000000e+00 : f32
      %40 = vector.broadcast %cst_16 : f32 to vector<16x128xf32>
      %41 = arith.select %39, %26, %40 : vector<16x128xi1>, vector<16x128xf32>
      %c0_17 = arith.constant 0 : index
      %c0_18 = arith.constant 0 : index
      %42 = vector.load %arg4[%c0_17, %c0_18] : memref<8x128xf32, #tpu.memory_space<vmem>>, vector<8x128xf32>
      %43 = vector.shape_cast %41 : vector<16x128xf32> to vector<2x8x128xf32>
      %cst_19 = arith.constant dense<0.000000e+00> : vector<8x128xf32>
      %44 = vector.multi_reduction <add>, %43, %cst_19 [0] : vector<2x8x128xf32> to vector<8x128xf32>
      %45 = arith.addf %42, %44 : vector<8x128xf32>
      %c0_20 = arith.constant 0 : index
      %c0_21 = arith.constant 0 : index
      %46 = vector.load %arg4[%c0_20, %c0_21] : memref<8x128xf32, #tpu.memory_space<vmem>>, vector<8x128xf32>
      tpu.vector_store %arg4[%c0_20, %c0_21], %45 {strides = array<i32>} : memref<8x128xf32, #tpu.memory_space<vmem>>, vector<8x128xf32>,
    } else {
    }
    return
  }
  func.func @transform_0(%arg0: i32, %arg1: i32) -> (i32, i32) {
    %c1_i32 = arith.constant 1 : i32
    %0 = arith.muli %arg0, %c1_i32 : i32
    %1 = arith.addi %0, %arg1 : i32
    %c0_i32 = arith.constant 0 : i32
    %2 = arith.minsi %1, %c0_i32 : i32
    %c0_i32_0 = arith.constant 0 : i32
    %c0_i32_1 = arith.constant 0 : i32
    return %2, %c0_i32_0 : i32, i32
  }
  func.func @transform_1(%arg0: i32, %arg1: i32) -> (i32, i32) {
    %c1_i32 = arith.constant 1 : i32
    %0 = arith.muli %arg0, %c1_i32 : i32
    %1 = arith.addi %0, %arg1 : i32
    %c0_i32 = arith.constant 0 : i32
    %2 = arith.minsi %1, %c0_i32 : i32
    %c0_i32_0 = arith.constant 0 : i32
    %c0_i32_1 = arith.constant 0 : i32
    return %2, %c0_i32_0 : i32, i32
  }
  func.func @transform_2(%arg0: i32, %arg1: i32) -> (i32, i32) {
    %c0_i32 = arith.constant 0 : i32
    %c0_i32_0 = arith.constant 0 : i32
    return %arg0, %c0_i32 : i32, i32
  }
}

</mosaic_0001>

<bundles_post_ra>
// kernel: tpu_custom_call.1
= control target key start
LH: loop header
LB: loop body
LE: loop exit
PB: predicated region body
PF: predicated region fallthrough
CT: control target
= control target key end

     0   :  { %7 = vsyncpa [#allocation3], 0  ;;  %s311_s0 = inlined_call_operand.hbm [shape: f32[16,128], index: 0, kind: input, shape index: {}]   ;;  %s312_s1 = inlined_call_operand.hbm [shape: f32[16,128], index: 1, kind: input, shape index: {}]   ;;  %s313_s2 = inlined_call_operand.hbm [shape: f32[8,128], index: 2, kind: output, shape index: {}]  }
   0x1   :  { %8 = vsyncpa [#allocation6], 0 }
   0x2   :  { %9 = vsyncpa [#allocation4], 0  ;;  %s255_s9 = smov [#allocation2]   ;;  %s183_s13 = scalar_lea.hbm %s311_s0, 256 }
   0x3   :  { %s21_s10 = sshll.u32 %s255_s9, 4  ;;  %p184_p0 = scmp.ne.s32.totalorder %s311_s0, %s183_s13  ;;  %s22_s10 = int_to_ptr.vmem [resolvable:$true] %s21_s10 }
   0x4   :  { %p187_p1 = scmp.lt.u32.totalorder %s183_s13, %s311_s0 }
   0x6   :  { %p189_p2 = pnand %p187_p1, %p184_p0 }
   0x8   :  { %192 = shalt.err (!%p189_p2)
}
   0x9   :  { %s193_s18 = scalar_lea.vmem %s22_s10, 256  ;;  %p198_p4 = scmp.lt.s32.totalorder %s22_s10, %s22_s10 }
   0xa   :  { %p194_p3 = scmp.ne.s32.totalorder %s22_s10, %s193_s18  ;;  %p199_p5 = scmp.lt.s32.totalorder %s193_s18, %s193_s18 }
   0xc   :  { %p200_p6 = por %p199_p5, %p198_p4 }
   0xe   :  { %p201_p7 = pnand %p200_p6, %p194_p3 }
  0x10   :  { %204 = shalt.err (!%p201_p7)
}
  0x11   :  { %s256_s19 = smov 128   ;;  %s257_s20 = smov 8  }
  0x12   :  { %27 = dma.hbm_to_vmem [thread:$0]  %s311_s0, 256, %s22_s10, [#allocation3], %s256_s19, %s256_s19, %s257_s20  }
  0x13   :  { %s258_s23 = smov [#allocation5]   ;;  %s205_s27 = scalar_lea.hbm %s312_s1, 256 }
  0x14   :  { %s39_s24 = sshll.u32 %s258_s23, 4  ;;  %p206_p8 = scmp.ne.s32.totalorder %s312_s1, %s205_s27  ;;  %s40_s24 = int_to_ptr.vmem [resolvable:$true] %s39_s24 }
  0x15   :  { %p209_p9 = scmp.lt.u32.totalorder %s205_s27, %s312_s1 }
  0x17   :  { %p211_p10 = pnand %p209_p9, %p206_p8 }
  0x19   :  { %214 = shalt.err (!%p211_p10)
}
  0x1a   :  { %s215_s4 = scalar_lea.vmem %s40_s24, 256  ;;  %p220_p12 = scmp.lt.s32.totalorder %s40_s24, %s40_s24 }
  0x1b   :  { %p216_p11 = scmp.ne.s32.totalorder %s40_s24, %s215_s4  ;;  %p221_p13 = scmp.lt.s32.totalorder %s215_s4, %s215_s4 }
  0x1d   :  { %p222_p0 = por %p221_p13, %p220_p12 }
  0x1f   :  { %p223_p1 = pnand %p222_p0, %p216_p11 }
  0x21   :  { %226 = shalt.err (!%p223_p1)
}
  0x22   :  { %45 = dma.hbm_to_vmem [thread:$0]  %s312_s1, 256, %s40_s24, [#allocation6], %s256_s19, %s256_s19, %s257_s20  }
  0x23   :  { %249 = dma.done.wait [#allocation3], 256  }
  0x24   :  { %250 = vsyncadd [#allocation3], 4294967040 }
  0x25   :  { %251 = dma.done.wait [#allocation6], 256  }
  0x26   :  { %252 = vsyncadd [#allocation6], 4294967040  ;;  %v67_v0 = vld [vmem:[#allocation2] sm:$0xff]  ;;  %v68_v1 = vld [vmem:[#allocation2 + $0x8] sm:$0xff]  ;;  %s259_s1 = smov [#allocation7]  }
  0x27   :  { %v71_v2 = vand.u32 2147483647, %v67_v0  ;;  %v72_v3 = vand.u32 2147483647, %v68_v1  ;;  %v69_v14 = vld [vmem:[#allocation5] sm:$0xff]  ;;  %v70_v15 = vld [vmem:[#allocation5 + $0x8] sm:$0xff] }
  0x28   :  { %v79_v17 = vmax.f32 %v67_v0, 0.0  ;;  %v81_v18 = vmul.f32 %v69_v14, %v67_v0  ;;  %v80_v21 = vmax.f32 %v68_v1, 0.0  ;;  %v82_v22 = vmul.f32 %v70_v15, %v68_v1  ;;  %s151_s6 = sshll.u32 %s259_s1, 4  ;;  %s152_s6 = int_to_ptr.vmem [resolvable:$true] %s151_s6 }
  0x29   :  { %v73_v4 = vsub.f32 0.0, %v71_v2  ;;  %v74_v5 = vsub.f32 0.0, %v72_v3  ;;  %s227_s7 = scalar_lea.vmem %s152_s6, 128  ;;  %p232_p3 = scmp.lt.s32.totalorder %s152_s6, %s152_s6 }
  0x2a   :  { %v83_v26 = vsub.f32 %v79_v17, %v81_v18  ;;  %v84_v29 = vsub.f32 %v80_v21, %v82_v22  ;;  %p228_p2 = scmp.ne.s32.totalorder %s152_s6, %s227_s7  ;;  %p233_p4 = scmp.lt.s32.totalorder %s227_s7, %s227_s7 }
  0x2b   :  { %v75_v6 = vmul.f32 1.442695, %v73_v4  ;;  %v77_v7 = vmul.f32 1.442695, %v74_v5 }
  0x2c   :  { %p234_p5 = por %p233_p4, %p232_p3 }
  0x2d   :  { %171 = vpow2.f32 %v75_v6 }
  0x2e   :  { %173 = vpow2.f32 %v77_v7  ;;  %p235_p6 = pnand %p234_p5, %p228_p2 }
  0x37   :  { %v172_v8 = vpop.eup %171 }
  0x38   :  { %v174_v9 = vpop.eup %173  ;;  %v85_v10 = vadd.f32 1.0, %v172_v8  ;;  %v88_v12 = vmul.f32 -0.5, %v172_v8  ;;  %v91_v19 = vand.u32 2147483647, %v172_v8 }
  0x39   :  { %v94_v11 = vadd.f32 1.0, %v174_v9  ;;  %v97_v13 = vmul.f32 -0.5, %v174_v9  ;;  %v100_v23 = vand.u32 2147483647, %v174_v9 }
  0x3a   :  { %175 = vlog2.f32 %v85_v10  ;;  %v89_v16 = vadd.f32 1.0, %v88_v12  ;;  %vm92_vm0 = vcmp.lt.f32.partialorder %v91_v19, 0.0004427343 }
  0x3b   :  { %177 = vlog2.f32 %v94_v11  ;;  %v98_v20 = vadd.f32 1.0, %v97_v13  ;;  %vm101_vm1 = vcmp.lt.f32.partialorder %v100_v23, 0.0004427343 }
  0x3c   :  { %v90_v24 = vmul.f32 %v172_v8, %v89_v16 }
  0x3d   :  { %v99_v27 = vmul.f32 %v174_v9, %v98_v20 }
  0x44   :  { %v176_v25 = vpop.eup %175 }
  0x45   :  { %v178_v28 = vpop.eup %177  ;;  %v87_v30 = vmul.f32 0.6931472, %v176_v25 }
  0x46   :  { %v96_v31 = vmul.f32 0.6931472, %v178_v28 }
  0x47   :  { %v93_v32 = vsel %vm92_vm0, %v90_v24, %v87_v30 }
  0x48   :  { %v102_v33 = vsel %vm101_vm1, %v99_v27, %v96_v31  ;;  %v103_v34 = vadd.f32 %v93_v32, %v83_v26 }
  0x49   :  { %v104_v35 = vadd.f32 %v102_v33, %v84_v29 }
  0x4a   :  { %v105_v36 = vsub.f32 0.0, %v103_v34 }
  0x4b   :  { %v106_v37 = vsub.f32 0.0, %v104_v35 }
  0x4c   :  { %v107_v38 = vmul.f32 1.442695, %v105_v36 }
  0x4d   :  { %v109_v39 = vmul.f32 1.442695, %v106_v37 }
  0x4e   :  { %179 = vpow2.f32 %v107_v38 }
  0x4f   :  { %181 = vpow2.f32 %v109_v39 }
  0x58   :  { %v180_v40 = vpop.eup %179 }
  0x59   :  { %v182_v41 = vpop.eup %181  ;;  %v111_v42 = vsub.f32 1.0, %v180_v40 }
  0x5a   :  { %v112_v43 = vsub.f32 1.0, %v182_v41 }
  0x5b   :  { %v113_v44 = vmax.f32 %v111_v42, 0.0 }
  0x5c   :  { %v114_v45 = vmax.f32 %v112_v43, 0.0 }
  0x5d   :  { %v115_v46 = vmul.f32 %v113_v44, %v113_v44 }
  0x5e   :  { %v116_v47 = vmul.f32 %v114_v45, %v114_v45 }
  0x5f   :  { %v117_v48 = vmul.f32 %v115_v46, %v103_v34 }
  0x60   :  { %v118_v49 = vmul.f32 %v116_v47, %v104_v35 }
  0x62   :  { %v125_v50 = vadd.f32 %v118_v49, %v117_v48 }
  0x64   :  { %127 = vst [vmem:[#allocation7] sm:$0xff] %v125_v50 }
  0x65   :  { %238 = shalt.err (!%p235_p6)
}
  0x66   :  { %s239_s10 = scalar_lea.hbm %s313_s2, 128 }
  0x67   :  { %p240_p7 = scmp.ne.s32.totalorder %s313_s2, %s239_s10  ;;  %p243_p8 = scmp.lt.u32.totalorder %s239_s10, %s313_s2 }
  0x69   :  { %p245_p9 = pnand %p243_p8, %p240_p7 }
  0x6b   :  { %248 = shalt.err (!%p245_p9)
}
  0x6c   :  { %154 = dma.vmem_to_hbm [thread:$0]  %s152_s6, 128, %s313_s2, [#allocation4]  }
  0x6d   :  { %253 = dma.done.wait [#allocation4], 128  }
  0x6e   :  { %254 = vsyncadd [#allocation4], 4294967168 }
  0x6f   :  { %158 = vsyncpa [#allocation3], 1 }
  0x70   :  { %159 = vsyncpa [#allocation6], 1 }
  0x71   :  { %160 = vsyncpa [#allocation4], 1 }

</bundles_post_ra>
